<compile_context>
chip_gen: v7x
topology: tpu7x:2x2x1
jax: 0.10.0
libtpu: 0.0.40
codegen_flags: <defaults>
</compile_context>

<pallas_src>
import jax
import jax.numpy as jnp
import numpy as np
from jax.experimental import pallas as pl
from jax.experimental.pallas import tpu as pltpu


# ---------------------------------------------------------------------------
# Host-side constant operators (exact PyTorch semantics), built once per shape.
# ---------------------------------------------------------------------------
def _adaptive_pool_matrix(out_size, in_size):
    """P[o, i] = 1/|region_o| over PyTorch adaptive_avg_pool regions."""
    P = np.zeros((out_size, in_size), np.float32)
    for o in range(out_size):
        s = (o * in_size) // out_size
        e = ((o + 1) * in_size + out_size - 1) // out_size
        P[o, s:e] = 1.0 / float(e - s)
    return P


def _bilinear_matrix(out_size, in_size):
    """U[o, i]: 1-D bilinear interpolation weights, align_corners=False."""
    U = np.zeros((out_size, in_size), np.float32)
    if in_size == 1:
        U[:, 0] = 1.0
        return U
    scale = in_size / out_size
    for o in range(out_size):
        src = (o + 0.5) * scale - 0.5
        if src < 0.0:
            src = 0.0
        i0 = min(int(np.floor(src)), in_size - 1)
        i1 = min(i0 + 1, in_size - 1)
        lam = src - i0
        U[o, i0] += 1.0 - lam
        U[o, i1] += lam
    return U


def _build_pyramid_matrices(H, W, grids, num_levels):
    ar = W / H
    p2_list, u2_list, gsizes = [], [], []
    for i in range(num_levels):
        gh = grids[i]
        gw = max(1, round(ar * grids[i]))
        Ph = _adaptive_pool_matrix(gh, H)
        Pw = _adaptive_pool_matrix(gw, W)
        Uh = _bilinear_matrix(H, gh)
        Uw = _bilinear_matrix(W, gw)
        p2_list.append(np.kron(Ph, Pw).astype(np.float32))   # (gh*gw, H*W)
        u2_list.append(np.kron(Uh, Uw).astype(np.float32))   # (H*W, gh*gw)
        gsizes.append(gh * gw)
    return p2_list, u2_list, gsizes


def _pick_row_tile(H, W, row_tile):
    """Largest whole-image-row tile that divides HW and is lane-friendly."""
    HW = H * W
    if HW <= row_tile:
        return HW
    rows = max(1, row_tile // W)
    for d in range(min(rows, H), 0, -1):
        if H % d == 0 and (d * W) % 128 == 0:
            return d * W
    return HW


# ---------------------------------------------------------------------------
# Kernel A: bottleneck ReluConv + adaptive-avg-pool accumulation + level convs
# ---------------------------------------------------------------------------
def _bottleneck_levels_kernel(x_ref, wbn_ref, bbn_ref, p2_ref, wcat_ref,
                              bcat_ref, mask_ref, x0_ref, lvl_ref, pooled_acc):
    t = pl.program_id(1)

    @pl.when(t == 0)
    def _init():
        pooled_acc[...] = jnp.zeros_like(pooled_acc)

    # Bottleneck 1x1 ReluConv on this pixel tile (bf16 MXU, f32 accumulate).
    xr = jnp.maximum(x_ref[0], 0.0).astype(jnp.bfloat16)              # (tm, Cin)
    x0 = jnp.dot(xr, wbn_ref[...], preferred_element_type=jnp.float32) + bbn_ref[...]
    x0_bf = x0.astype(jnp.bfloat16)
    x0_ref[0] = x0_bf                                                  # (tm, bt)

    # Adaptive-avg-pool of all levels at once: pooled += P2cat[:, tile] @ x0_tile.
    pooled_acc[...] += jnp.dot(p2_ref[t], x0_bf,
                               preferred_element_type=jnp.float32)     # (Kpad, bt)

    @pl.when(t == pl.num_programs(1) - 1)
    def _finalize():
        # Per-level 1x1 ReluConvs merged into one lane-dense matmul + block mask.
        pooled = jnp.maximum(pooled_acc[...], 0.0).astype(jnp.bfloat16)
        full = jnp.dot(pooled, wcat_ref[...],
                       preferred_element_type=jnp.float32) + bcat_ref[...]
        lvl_ref[0] = (full * mask_ref[...]).astype(lvl_ref.dtype)      # (Kpad, LSpad)


# ---------------------------------------------------------------------------
# Kernel B: fused bilinear upsample + channel concat + fuse ReluConv
# ---------------------------------------------------------------------------
def _fuse_kernel(x0_ref, u2_ref, lvl_ref, wf0_ref, wfl_ref, bf_ref, out_ref):
    x0 = jnp.maximum(x0_ref[0], 0.0).astype(jnp.bfloat16)             # (tp, bt)
    acc = jnp.dot(x0, wf0_ref[...], preferred_element_type=jnp.float32)
    # All three upsampled levels in one product: (tp, Kpad) @ (Kpad, LSpad).
    up = jnp.dot(u2_ref[...], lvl_ref[0], preferred_element_type=jnp.float32)
    up = jnp.maximum(up, 0.0).astype(jnp.bfloat16)
    acc = acc + jnp.dot(up, wfl_ref[...], preferred_element_type=jnp.float32)
    out_ref[0] = (acc + bf_ref[...]).astype(out_ref.dtype)


# ---------------------------------------------------------------------------
# Wrapper
# ---------------------------------------------------------------------------
def spatial_pyramid_pooling_forward(x_nhwc, w_bn, b_bn, w_lvls, b_lvls,
                                    w_fuse, b_fuse, *,
                                    grids=(8, 4, 2, 1), row_tile=1024):
    """x_nhwc: (N, H, W, Cin) f32.  1x1 conv weights are (in, out) matrices."""
    N, H, W, Cin = x_nhwc.shape
    bt = w_bn.shape[1]
    n_levels = len(w_lvls)
    level_size = w_lvls[0].shape[1]
    out_size = w_fuse.shape[1]
    assert w_fuse.shape[0] == bt + n_levels * level_size
    HW = H * W
    M = N * HW

    # ---- host-side constants: pooling / upsample operators, padded & packed
    p2_np, u2_np, gsizes = _build_pyramid_matrices(H, W, grids, n_levels)
    sum_g2 = sum(gsizes)
    Kpad = ((sum_g2 + 7) // 8) * 8                       # level "pixels" (row dim)
    lvl_cols = n_levels * level_size
    LSpad = max(128, ((lvl_cols + 127) // 128) * 128)    # lane-dense level channels

    P2cat = np.zeros((Kpad, HW), np.float32)
    U2cat = np.zeros((HW, Kpad), np.float32)
    mask_np = np.zeros((Kpad, LSpad), np.float32)
    off = 0
    for i, g2 in enumerate(gsizes):
        P2cat[off:off + g2, :] = p2_np[i]
        U2cat[:, off:off + g2] = u2_np[i]
        mask_np[off:off + g2, i * level_size:(i + 1) * level_size] = 1.0
        off += g2

    tm = _pick_row_tile(H, W, row_tile)
    T1 = HW // tm
    # Pack P2 as (T1, Kpad, tm) so it can live resident in VMEM and be indexed by tile.
    P2cat_t = np.ascontiguousarray(
        P2cat.reshape(Kpad, T1, tm).transpose(1, 0, 2))

    p2_bf = jnp.asarray(P2cat_t).astype(jnp.bfloat16)
    u2_bf = jnp.asarray(U2cat).astype(jnp.bfloat16)
    mask_f = jnp.asarray(mask_np)

    # Level-conv weights merged into one (bt, LSpad) matrix + bias row.
    wcat = jnp.zeros((bt, LSpad), jnp.float32).at[:, :lvl_cols].set(
        jnp.concatenate([jnp.asarray(w) for w in w_lvls], axis=1))
    bcat = jnp.zeros((1, LSpad), jnp.float32).at[0, :lvl_cols].set(
        jnp.concatenate([jnp.asarray(b) for b in b_lvls]))
    # Fuse weights split into the x0 part and the stacked (padded) level part.
    wf0 = w_fuse[:bt].astype(jnp.bfloat16)
    wflcat = jnp.zeros((LSpad, out_size), jnp.float32).at[:lvl_cols].set(
        w_fuse[bt:bt + lvl_cols]).astype(jnp.bfloat16)

    wbn_bf = w_bn.astype(jnp.bfloat16)
    bbn_f = b_bn.reshape(1, bt).astype(jnp.float32)
    wcat_bf = wcat.astype(jnp.bfloat16)
    bf_f = b_fuse.reshape(1, out_size).astype(jnp.float32)

    x3d = x_nhwc.reshape(N, HW, Cin)

    # ---------------- kernel A: bottleneck + pooling + level convs ----------------
    ka_flops = 2 * M * Cin * bt + 2 * M * sum_g2 * bt + 2 * N * sum_g2 * bt * lvl_cols
    ka_bytes = (M * Cin * 4 + M * bt * 2 + Kpad * HW * 2 + N * Kpad * LSpad * 2
                + (Cin * bt + bt * LSpad) * 2 + Kpad * LSpad * 4)
    x0, lvl = pl.pallas_call(
        _bottleneck_levels_kernel,
        out_shape=(jax.ShapeDtypeStruct((N, HW, bt), jnp.bfloat16),
                   jax.ShapeDtypeStruct((N, Kpad, LSpad), jnp.bfloat16)),
        grid=(N, T1),
        in_specs=[
            pl.BlockSpec((1, tm, Cin), lambda n, t: (n, t, 0)),       # x tile
            pl.BlockSpec((Cin, bt), lambda n, t: (0, 0)),             # Wbn (resident)
            pl.BlockSpec((1, bt), lambda n, t: (0, 0)),               # bbn
            pl.BlockSpec((T1, Kpad, tm), lambda n, t: (0, 0, 0)),     # P2cat (resident)
            pl.BlockSpec((bt, LSpad), lambda n, t: (0, 0)),           # Wcat (resident)
            pl.BlockSpec((1, LSpad), lambda n, t: (0, 0)),            # bcat
            pl.BlockSpec((Kpad, LSpad), lambda n, t: (0, 0)),         # block-diag mask
        ],
        out_specs=(pl.BlockSpec((1, tm, bt), lambda n, t: (n, t, 0)),
                   pl.BlockSpec((1, Kpad, LSpad), lambda n, t: (n, 0, 0))),
        scratch_shapes=[pltpu.VMEM((Kpad, bt), jnp.float32)],
        compiler_params=pltpu.CompilerParams(
            dimension_semantics=("parallel", "arbitrary")),
        cost_estimate=pl.CostEstimate(flops=int(ka_flops), transcendentals=0,
                                      bytes_accessed=int(ka_bytes)),
    )(x3d, wbn_bf, bbn_f, p2_bf, wcat_bf, bcat, mask_f)

    # ---------------- kernel B: upsample + concat + fuse ReluConv ----------------
    tp = tm
    T2 = HW // tp
    kb_flops = 2 * M * bt * out_size + 2 * M * sum_g2 * lvl_cols + 2 * M * lvl_cols * out_size
    kb_bytes = (M * bt * 2 + HW * Kpad * 2 + N * T2 * Kpad * LSpad * 2
                + M * out_size * 4 + (bt + LSpad) * out_size * 2)
    out = pl.pallas_call(
        _fuse_kernel,
        out_shape=jax.ShapeDtypeStruct((N, HW, out_size), jnp.float32),
        grid=(T2, N),   # row-tile axis first: U2 reused across batch, 2-TC sharding
        in_specs=[
            pl.BlockSpec((1, tp, bt), lambda t, n: (n, t, 0)),        # x0 tile
            pl.BlockSpec((tp, Kpad), lambda t, n: (t, 0)),            # U2cat row tile
            pl.BlockSpec((1, Kpad, LSpad), lambda t, n: (n, 0, 0)),   # block-diag levels
            pl.BlockSpec((bt, out_size), lambda t, n: (0, 0)),        # Wf0 (resident)
            pl.BlockSpec((LSpad, out_size), lambda t, n: (0, 0)),     # Wfl (resident)
            pl.BlockSpec((1, out_size), lambda t, n: (0, 0)),         # bf
        ],
        out_specs=pl.BlockSpec((1, tp, out_size), lambda t, n: (n, t, 0)),
        compiler_params=pltpu.CompilerParams(
            dimension_semantics=("parallel", "parallel")),
        cost_estimate=pl.CostEstimate(flops=int(kb_flops), transcendentals=0,
                                      bytes_accessed=int(kb_bytes)),
    )(x0, u2_bf, lvl, wf0, wflcat, bf_f)

    return out.reshape(N, H, W, out_size)


# ---------------------------------------------------------------------------
# Pure-JAX (XLA) reference, f32 end-to-end
# ---------------------------------------------------------------------------
def _reference_forward(x_nhwc, w_bn, b_bn, w_lvls, b_lvls, w_fuse, b_fuse,
                       *, grids=(8, 4, 2, 1)):
    N, H, W, Cin = x_nhwc.shape
    bt = w_bn.shape[1]
    n_levels = len(w_lvls)
    level_size = w_lvls[0].shape[1]
    HW = H * W
    p2_np, u2_np, _ = _build_pyramid_matrices(H, W, grids, n_levels)

    x0 = jnp.maximum(x_nhwc.reshape(N, HW, Cin), 0.0) @ w_bn + b_bn
    acc = jnp.maximum(x0, 0.0) @ w_fuse[:bt]
    for i in range(n_levels):
        pooled = jnp.einsum('pq,nqc->npc', jnp.asarray(p2_np[i]), x0)
        lvl = jnp.maximum(pooled, 0.0) @ w_lvls[i] + b_lvls[i]
        up = jnp.einsum('qp,npc->nqc', jnp.asarray(u2_np[i]), lvl)
        acc = acc + jnp.maximum(up, 0.0) @ w_fuse[bt + i * level_size:
                                                  bt + (i + 1) * level_size]
    out = acc + b_fuse
    return out.reshape(N, H, W, -1)


if __name__ == "__main__":
    # SpatialPyramidPooling(num_maps_in=128, num_levels=3, bt_size=128,
    #                       out_size=128, grids=(8,4,2,1), norm=False) defaults.
    N, H, W = 2, 16, 16
    num_maps_in = 128
    bt_size, out_size, num_levels = 128, 128, 3
    grids = (8, 4, 2, 1)
    level_size = out_size // num_levels               # 42
    final_size = bt_size + num_levels * level_size    # 254

    key = jax.random.PRNGKey(0)
    keys = jax.random.split(key, 5 + 2 * num_levels)

    def conv1x1_init(kw, kb, fan_in, fan_out):
        # PyTorch Conv2d(k=1) default init: uniform(+-1/sqrt(fan_in)).
        bound = 1.0 / np.sqrt(fan_in)
        w = jax.random.uniform(kw, (fan_in, fan_out), jnp.float32, -bound, bound)
        b = jax.random.uniform(kb, (fan_out,), jnp.float32, -bound, bound)
        return w, b

    x = jax.random.normal(keys[0], (N, H, W, num_maps_in), jnp.float32)
    w_bn, b_bn = conv1x1_init(keys[1], keys[2], num_maps_in, bt_size)
    w_lvls, b_lvls = [], []
    for i in range(num_levels):
        w, b = conv1x1_init(keys[3 + 2 * i], keys[4 + 2 * i], bt_size, level_size)
        w_lvls.append(w)
        b_lvls.append(b)
    w_fuse, b_fuse = conv1x1_init(keys[3 + 2 * num_levels],
                                  keys[4 + 2 * num_levels], final_size, out_size)

    out = spatial_pyramid_pooling_forward(x, w_bn, b_bn, w_lvls, b_lvls,
                                          w_fuse, b_fuse, grids=grids)
    jax.block_until_ready(out)

    out_ref = _reference_forward(x, w_bn, b_bn, w_lvls, b_lvls, w_fuse, b_fuse,
                                 grids=grids)
    np.testing.assert_allclose(np.asarray(out), np.asarray(out_ref),
                               rtol=5e-2, atol=5e-2)
    print("KERNEL_OK")
</pallas_src>

<mosaic_0001>
module attributes {stable_mosaic.version = 11 : i64} {
  func.func @_bottleneck_levels_kernel(%arg0: i32, %arg1: i32, %arg2: memref<1x256x128xf32, #tpu.memory_space<vmem>>, %arg3: memref<128x128xbf16, #tpu.memory_space<vmem>>, %arg4: memref<1x128xf32, #tpu.memory_space<vmem>>, %arg5: memref<1x88x256xbf16, #tpu.memory_space<vmem>>, %arg6: memref<128x128xbf16, #tpu.memory_space<vmem>>, %arg7: memref<1x128xf32, #tpu.memory_space<vmem>>, %arg8: memref<88x128xf32, #tpu.memory_space<vmem>>, %arg9: memref<1x256x128xbf16, #tpu.memory_space<vmem>>, %arg10: memref<1x88x128xbf16, #tpu.memory_space<vmem>>, %arg11: memref<88x128xf32, #tpu.memory_space<vmem>>) attributes {dimension_semantics = [#tpu.dimension_semantics<parallel>, #tpu.dimension_semantics<arbitrary>], iteration_bounds = array<i64: 2, 1>, scalar_prefetch = 0 : i64, scratch_operands = 1 : i64, tpu.core_type = #tpu.core_type<tc>, window_params = [{transform_indices = @transform_0, window_bounds = array<i64: 1, 256, 128>}, {pipeline_mode = #tpu.pipeline_mode<synchronous>, transform_indices = @transform_1, window_bounds = array<i64: 128, 128>}, {pipeline_mode = #tpu.pipeline_mode<synchronous>, transform_indices = @transform_2, window_bounds = array<i64: 1, 128>}, {pipeline_mode = #tpu.pipeline_mode<synchronous>, transform_indices = @transform_3, window_bounds = array<i64: 1, 88, 256>}, {pipeline_mode = #tpu.pipeline_mode<synchronous>, transform_indices = @transform_4, window_bounds = array<i64: 128, 128>}, {pipeline_mode = #tpu.pipeline_mode<synchronous>, transform_indices = @transform_5, window_bounds = array<i64: 1, 128>}, {pipeline_mode = #tpu.pipeline_mode<synchronous>, transform_indices = @transform_6, window_bounds = array<i64: 88, 128>}, {transform_indices = @transform_7, window_bounds = array<i64: 1, 256, 128>}, {transform_indices = @transform_8, window_bounds = array<i64: 1, 88, 128>}]} {
    %c0_i32 = arith.constant 0 : i32
    %0 = arith.cmpi eq, %arg1, %c0_i32 : i32
    %1 = arith.extui %0 : i1 to i32
    %c0_i32_0 = arith.constant 0 : i32
    %2 = arith.cmpi ne, %1, %c0_i32_0 : i32
    scf.if %2 {
      %cst_20 = arith.constant 0.000000e+00 : f32
      %27 = vector.broadcast %cst_20 : f32 to vector<88x128xf32>
      %c0_21 = arith.constant 0 : index
      %c0_22 = arith.constant 0 : index
      %28 = vector.load %arg11[%c0_21, %c0_22] : memref<88x128xf32, #tpu.memory_space<vmem>>, vector<88x128xf32>
      tpu.vector_store %arg11[%c0_21, %c0_22], %27 {strides = array<i32>} : memref<88x128xf32, #tpu.memory_space<vmem>>, vector<88x128xf32>,
    } else {
    }
    %c0 = arith.constant 0 : index
    %c0_1 = arith.constant 0 : index
    %c0_2 = arith.constant 0 : index
    %3 = vector.load %arg2[%c0, %c0_1, %c0_2] : memref<1x256x128xf32, #tpu.memory_space<vmem>>, vector<1x256x128xf32>
    %4 = vector.shape_cast %3 : vector<1x256x128xf32> to vector<256x128xf32>
    %cst = arith.constant 0.000000e+00 : f32
    %5 = vector.broadcast %cst : f32 to vector<256x128xf32>
    %6 = arith.maximumf %4, %5 : vector<256x128xf32>
    %7 = arith.truncf %6 : vector<256x128xf32> to vector<256x128xbf16>
    %c0_3 = arith.constant 0 : index
    %c0_4 = arith.constant 0 : index
    %8 = vector.load %arg3[%c0_3, %c0_4] : memref<128x128xbf16, #tpu.memory_space<vmem>>, vector<128x128xbf16>
    %cst_5 = arith.constant dense<0.000000e+00> : vector<256x128xf32>
    %9 = tpu.matmul %7, %8, %cst_5 {dimension_numbers = #tpu.dot_dimension_numbers<[1], [0], [0], [1], [0, 0, 1, 1], [], []>} : vector<256x128xbf16>, vector<128x128xbf16>, vector<256x128xf32> -> vector<256x128xf32>
    %c0_6 = arith.constant 0 : index
    %c0_7 = arith.constant 0 : index
    %10 = vector.load %arg4[%c0_6, %c0_7] : memref<1x128xf32, #tpu.memory_space<vmem>>, vector<1x128xf32>
    %11 = vector.broadcast %10 : vector<1x128xf32> to vector<256x128xf32>
    %12 = arith.addf %9, %11 : vector<256x128xf32>
    %13 = arith.truncf %12 : vector<256x128xf32> to vector<256x128xbf16>
    %c0_8 = arith.constant 0 : index
    %c0_9 = arith.constant 0 : index
    %c0_10 = arith.constant 0 : index
    %14 = vector.load %arg9[%c0_8, %c0_9, %c0_10] : memref<1x256x128xbf16, #tpu.memory_space<vmem>>, vector<1x256x128xbf16>
    %15 = vector.shape_cast %14 : vector<1x256x128xbf16> to vector<256x128xbf16>
    %16 = vector.shape_cast %13 : vector<256x128xbf16> to vector<1x256x128xbf16>
    tpu.vector_store %arg9[%c0_8, %c0_9, %c0_10], %16 {strides = array<i32>} : memref<1x256x128xbf16, #tpu.memory_space<vmem>>, vector<1x256x128xbf16>,
    %c0_11 = arith.constant 0 : index
    %c0_12 = arith.constant 0 : index
    %17 = vector.load %arg11[%c0_11, %c0_12] : memref<88x128xf32, #tpu.memory_space<vmem>>, vector<88x128xf32>
    %18 = arith.index_cast %arg1 : i32 to index
    %c0_13 = arith.constant 0 : index
    %c0_14 = arith.constant 0 : index
    %19 = vector.load %arg5[%18, %c0_13, %c0_14] : memref<1x88x256xbf16, #tpu.memory_space<vmem>>, vector<1x88x256xbf16>
    %20 = vector.shape_cast %19 : vector<1x88x256xbf16> to vector<88x256xbf16>
    %cst_15 = arith.constant dense<0.000000e+00> : vector<88x128xf32>
    %21 = tpu.matmul %20, %13, %cst_15 {dimension_numbers = #tpu.dot_dimension_numbers<[1], [0], [0], [1], [0, 0, 1, 1], [], []>} : vector<88x256xbf16>, vector<256x128xbf16>, vector<88x128xf32> -> vector<88x128xf32>
    %22 = arith.addf %17, %21 : vector<88x128xf32>
    %c0_16 = arith.constant 0 : index
    %c0_17 = arith.constant 0 : index
    %23 = vector.load %arg11[%c0_16, %c0_17] : memref<88x128xf32, #tpu.memory_space<vmem>>, vector<88x128xf32>
    tpu.vector_store %arg11[%c0_16, %c0_17], %22 {strides = array<i32>} : memref<88x128xf32, #tpu.memory_space<vmem>>, vector<88x128xf32>,
    %c0_i32_18 = arith.constant 0 : i32
    %24 = arith.cmpi eq, %arg1, %c0_i32_18 : i32
    %25 = arith.extui %24 : i1 to i32
    %c0_i32_19 = arith.constant 0 : i32
    %26 = arith.cmpi ne, %25, %c0_i32_19 : i32
    scf.if %26 {
      %c0_20 = arith.constant 0 : index
      %c0_21 = arith.constant 0 : index
      %27 = vector.load %arg11[%c0_20, %c0_21] : memref<88x128xf32, #tpu.memory_space<vmem>>, vector<88x128xf32>
      %cst_22 = arith.constant 0.000000e+00 : f32
      %28 = vector.broadcast %cst_22 : f32 to vector<88x128xf32>
      %29 = arith.maximumf %27, %28 : vector<88x128xf32>
      %30 = arith.truncf %29 : vector<88x128xf32> to vector<88x128xbf16>
      %c0_23 = arith.constant 0 : index
      %c0_24 = arith.constant 0 : index
      %31 = vector.load %arg6[%c0_23, %c0_24] : memref<128x128xbf16, #tpu.memory_space<vmem>>, vector<128x128xbf16>
      %cst_25 = arith.constant dense<0.000000e+00> : vector<88x128xf32>
      %32 = tpu.matmul %30, %31, %cst_25 {dimension_numbers = #tpu.dot_dimension_numbers<[1], [0], [0], [1], [0, 0, 1, 1], [], []>} : vector<88x128xbf16>, vector<128x128xbf16>, vector<88x128xf32> -> vector<88x128xf32>
      %c0_26 = arith.constant 0 : index
      %c0_27 = arith.constant 0 : index
      %33 = vector.load %arg7[%c0_26, %c0_27] : memref<1x128xf32, #tpu.memory_space<vmem>>, vector<1x128xf32>
      %34 = vector.broadcast %33 : vector<1x128xf32> to vector<88x128xf32>
      %35 = arith.addf %32, %34 : vector<88x128xf32>
      %c0_28 = arith.constant 0 : index
      %c0_29 = arith.constant 0 : index
      %36 = vector.load %arg8[%c0_28, %c0_29] : memref<88x128xf32, #tpu.memory_space<vmem>>, vector<88x128xf32>
      %37 = arith.mulf %35, %36 : vector<88x128xf32>
      %38 = arith.truncf %37 : vector<88x128xf32> to vector<88x128xbf16>
      %c0_30 = arith.constant 0 : index
      %c0_31 = arith.constant 0 : index
      %c0_32 = arith.constant 0 : index
      %39 = vector.load %arg10[%c0_30, %c0_31, %c0_32] : memref<1x88x128xbf16, #tpu.memory_space<vmem>>, vector<1x88x128xbf16>
      %40 = vector.shape_cast %39 : vector<1x88x128xbf16> to vector<88x128xbf16>
      %41 = vector.shape_cast %38 : vector<88x128xbf16> to vector<1x88x128xbf16>
      tpu.vector_store %arg10[%c0_30, %c0_31, %c0_32], %41 {strides = array<i32>} : memref<1x88x128xbf16, #tpu.memory_space<vmem>>, vector<1x88x128xbf16>,
    } else {
    }
    return
  }
  func.func @transform_0(%arg0: i32, %arg1: i32) -> (i32, i32, i32) {
    %c0_i32 = arith.constant 0 : i32
    %c0_i32_0 = arith.constant 0 : i32
    return %arg0, %arg1, %c0_i32 : i32, i32, i32
  }
  func.func @transform_1(%arg0: i32, %arg1: i32) -> (i32, i32) {
    %c0_i32 = arith.constant 0 : i32
    %c0_i32_0 = arith.constant 0 : i32
    %c0_i32_1 = arith.constant 0 : i32
    return %c0_i32, %c0_i32_0 : i32, i32
  }
  func.func @transform_2(%arg0: i32, %arg1: i32) -> (i32, i32) {
    %c0_i32 = arith.constant 0 : i32
    %c0_i32_0 = arith.constant 0 : i32
    %c0_i32_1 = arith.constant 0 : i32
    return %c0_i32, %c0_i32_0 : i32, i32
  }
  func.func @transform_3(%arg0: i32, %arg1: i32) -> (i32, i32, i32) {
    %c0_i32 = arith.constant 0 : i32
    %c0_i32_0 = arith.constant 0 : i32
    %c0_i32_1 = arith.constant 0 : i32
    %c0_i32_2 = arith.constant 0 : i32
    return %c0_i32, %c0_i32_0, %c0_i32_1 : i32, i32, i32
  }
  func.func @transform_4(%arg0: i32, %arg1: i32) -> (i32, i32) {
    %c0_i32 = arith.constant 0 : i32
    %c0_i32_0 = arith.constant 0 : i32
    %c0_i32_1 = arith.constant 0 : i32
    return %c0_i32, %c0_i32_0 : i32, i32
  }
  func.func @transform_5(%arg0: i32, %arg1: i32) -> (i32, i32) {
    %c0_i32 = arith.constant 0 : i32
    %c0_i32_0 = arith.constant 0 : i32
    %c0_i32_1 = arith.constant 0 : i32
    return %c0_i32, %c0_i32_0 : i32, i32
  }
  func.func @transform_6(%arg0: i32, %arg1: i32) -> (i32, i32) {
    %c0_i32 = arith.constant 0 : i32
    %c0_i32_0 = arith.constant 0 : i32
    %c0_i32_1 = arith.constant 0 : i32
    return %c0_i32, %c0_i32_0 : i32, i32
  }
  func.func @transform_7(%arg0: i32, %arg1: i32) -> (i32, i32, i32) {
    %c0_i32 = arith.constant 0 : i32
    %c0_i32_0 = arith.constant 0 : i32
    return %arg0, %arg1, %c0_i32 : i32, i32, i32
  }
  func.func @transform_8(%arg0: i32, %arg1: i32) -> (i32, i32, i32) {
    %c0_i32 = arith.constant 0 : i32
    %c0_i32_0 = arith.constant 0 : i32
    %c0_i32_1 = arith.constant 0 : i32
    return %arg0, %c0_i32, %c0_i32_0 : i32, i32, i32
  }
}

</mosaic_0001>

<bundles_post_ra>
// kernel: tpu_custom_call.1
= control target key start
LH: loop header
LB: loop body
LE: loop exit
PB: predicated region body
PF: predicated region fallthrough
CT: control target
= control target key end

     0   :  { %s2915_s0 = inlined_call_operand.hbm [shape: f32[2,256,128], index: 0, kind: input, shape index: {}]   ;;  %s2916_s1 = inlined_call_operand.hbm [shape: bf16[128,128], index: 1, kind: input, shape index: {}]   ;;  %s2917_s2 = inlined_call_operand.vmem [shape: f32[1,128], index: 2, kind: input, shape index: {}]   ;;  %s2918_s3 = inlined_call_operand.hbm [shape: bf16[1,88,256], index: 3, kind: input, shape index: {}]   ;;  %s2919_s4 = inlined_call_operand.hbm [shape: bf16[128,128], index: 4, kind: input, shape index: {}]   ;;  %s2920_s5 = inlined_call_operand.vmem [shape: f32[1,128], index: 5, kind: input, shape index: {}]   ;;  %s2921_s6 = inlined_call_operand.hbm [shape: f32[88,128], index: 6, kind: input, shape index: {}]   ;;  %s2922_s7 = inlined_call_operand.hbm [shape: bf16[2,256,128], index: 7, kind: output, shape index: {0}]   ;;  %s2923_s8 = inlined_call_operand.hbm [shape: bf16[2,88,128], index: 8, kind: output, shape index: {1}]  }
   0x1   :  { %2932 = sst [smem:[#allocation22_spill]] %s2920_s5 }
   0x2   :  { %2933 = sst [smem:[#allocation23_spill]] %s2922_s7 }
   0x3   :  { %2934 = sst [smem:[#allocation24_spill]] %s2923_s8 }
   0x4   :  { %14 = vsyncpa [#allocation4], 0 }
   0x5   :  { %16 = vsyncpa [#allocation4 + $0x1], 0 }
   0x6   :  { %17 = vsyncpa [#allocation7], 0 }
   0x7   :  { %18 = vsyncpa [#allocation10], 0 }
   0x8   :  { %19 = vsyncpa [#allocation5], 0 }
   0x9   :  { %21 = vsyncpa [#allocation5 + $0x1], 0 }
   0xa   :  { %22 = vsyncpa [#allocation14], 0 }
   0xb   :  { %24 = vsyncpa [#allocation14 + $0x1], 0  ;;  %s2446_s27 = smov 0   ;;  %s2448_s28 = smov 0  }
   0xc   :  { %s2450_s29 = smov 0   ;;  %s2452_s30 = smov 0  }
   0xd   :  { %s2454_s9 = smov 0   ;;  %s2456_s10 = smov 0  }
   0xe LB: > { %2935 = sst [smem:[#allocation20_spill]] %s2366_s27  ;;  %s1541_s11 = sadd.s32 4294967295, %s2386_s10   ;;  %s2386_s10 = sphi %s2456_s10, %s30_s10   ;;  %s2382_s9 = sphi %s2454_s9, %s2961_s9   ;;  %s2378_s30 = sphi %s2452_s30, %s2960_s30   ;;  %s2374_s29 = sphi %s2450_s29, %s2959_s29   ;;  %s2370_s28 = sphi %s2448_s28, %s2958_s28   ;;  %s2366_s27 = sphi %s2446_s27, %s2957_s27  }
   0xf   : > { %s1542_s12 = sadd.s32 4294967294, %s2386_s10   ;;  %p64_p0 = scmp.ne.s32.totalorder %s2370_s28, %s2366_s27 }
  0x10   : > { %p2480_p1 = scmp.eq.s32.totalorder %s1541_s11, 0  ;;  %p2484_p2 = scmp.eq.s32.totalorder %s1541_s11, 1 }
  0x11   : > { %p222_p3 = scmp.eq.s32.totalorder %s1542_s12, 1  ;;  %p1543_p5 = scmp.ge.s32.totalorder %s2386_s10, 1 }
  0x12   : > { %s2936_s13 = scalar_select %p2480_p1, 1, 0 }
  0x13   : > { %s2937_s14 = scalar_select %p2484_p2, 1, 0 }
  0x14   : > { %p2490_p4 = por %p2480_p1, %p64_p0  ;;  %p2495_p6 = por %p222_p3, %p64_p0 }
  0x15   : > { %p255_p7 = scmp.lt.s32.totalorder %s2386_s10, 3  ;;  %s2388_s18 = smov [#allocation6]  }
  0x16   : > { %s2938_s15 = scalar_select %p2490_p4, 1, 0 }
  0x17   : > { %s2939_s16 = scalar_select %p2495_p6, 1, 0 }
  0x18   : > { %p2500_p8 = pnand %p1543_p5, %p255_p7  ;;  %s267_s19 = sshll.u32 %s2388_s18, 4  ;;  %s2504_s19 = int_to_ptr.vmem [resolvable:$true] %s267_s19 }
  0x19   : > { %2940 = sst [smem:[#allocation21_spill]] %s2939_s16  ;;  %s2389_s21 = smov [#allocation9]  }
  0x1a   : > { %s2941_s17 = scalar_select %p2500_p8, 1, 0 }
  0x1b   : > { %p1997_p9 = pneg %p2500_p8  ;;  %s296_s22 = sshll.u32 %s2389_s21, 4  ;;  %s2515_s22 = int_to_ptr.vmem [resolvable:$true] %s296_s22 }
  0x1c   : > { %s2390_s23 = smov [#allocation8]   ;;  %s2122_s11 = scalar_lea.hbm %s2916_s1, 1024 }
  0x1d   : > { %p2511_p11 = pnand %p1997_p9, %p2480_p1  ;;  %s2517_s24 = sshll.u32 %s2390_s23, 4  ;;  %s284_s24 = int_to_ptr.vmem [resolvable:$true] %s2517_s24 }
  0x1e   : > { %p2123_p12 = scmp.ne.s32.totalorder %s2916_s1, %s2122_s11  ;;  %p2129_p5 = scmp.lt.u32.totalorder %s2122_s11, %s2916_s1 }
  0x1f   : > { %p2527_p13 = pneg %p2511_p11 }
  0x21   : > { %p2125_p0 = pnand %p2527_p13, %p2123_p12 }
  0x23   : > { %p2126_p3 = pneg %p2125_p0 }
  0x25   : > { %p2131_p7 = pnand %p2129_p5, %p2126_p3 }
  0x27   : > { %2134 = shalt.err (!%p2131_p7)
}
  0x28   : > { %s2135_s25 = scalar_lea.vmem %s2504_s19, 1024  ;;  %p2143_p1 = scmp.lt.s32.totalorder %s2504_s19, %s2504_s19 }
  0x29   : > { %p2136_p9 = scmp.ne.s32.totalorder %s2504_s19, %s2135_s25  ;;  %p2144_p4 = scmp.lt.s32.totalorder %s2135_s25, %s2135_s25 }
  0x2b   : > { %p2138_p10 = pnand %p2136_p9, %p2527_p13  ;;  %p2145_p12 = por %p2144_p4, %p2143_p1 }
  0x2d   : > { %p2139_p6 = pneg %p2138_p10 }
  0x2f   : > { %p2146_p0 = pnand %p2145_p12, %p2139_p6 }
  0x31   : > { %2149 = shalt.err (!%p2146_p0)
}
  0x32   : > { %s2391_s26 = smov 64   ;;  %s2392_s11 = smov 4  }
  0x33   : > { %2000 = dma.hbm_to_vmem [thread:$0]  (!%p2511_p11), %s2916_s1, 1024, %s2504_s19, [#allocation7], %s2391_s26, %s2391_s26, %s2392_s11  }
  0x34   : > { %s2150_s27 = scalar_lea.hbm %s2919_s4, 1024 }
  0x35   : > { %p2151_p1 = scmp.ne.s32.totalorder %s2919_s4, %s2150_s27  ;;  %p2157_p10 = scmp.lt.u32.totalorder %s2150_s27, %s2919_s4 }
  0x37   : > { %p2153_p4 = pnand %p2151_p1, %p2527_p13 }
  0x39   : > { %p2154_p6 = pneg %p2153_p4 }
  0x3b   : > { %p2159_p3 = pnand %p2157_p10, %p2154_p6 }
  0x3d   : > { %2162 = shalt.err (!%p2159_p3)
}
  0x3e   : > { %s2163_s19 = scalar_lea.vmem %s2515_s22, 1024  ;;  %p2171_p12 = scmp.lt.s32.totalorder %s2515_s22, %s2515_s22 }
  0x3f   : > { %p2164_p5 = scmp.ne.s32.totalorder %s2515_s22, %s2163_s19  ;;  %p2172_p0 = scmp.lt.s32.totalorder %s2163_s19, %s2163_s19 }
  0x41   : > { %p2166_p7 = pnand %p2164_p5, %p2527_p13  ;;  %p2173_p1 = por %p2172_p0, %p2171_p12 }
  0x43   : > { %p2167_p9 = pneg %p2166_p7 }
  0x45   : > { %p2174_p4 = pnand %p2173_p1, %p2167_p9 }
  0x47   : > { %2177 = shalt.err (!%p2174_p4)
}
  0x48   : > { %2006 = dma.hbm_to_vmem [thread:$0]  (!%p2511_p11), %s2919_s4, 1024, %s2515_s22, [#allocation10], %s2391_s26, %s2391_s26, %s2392_s11  }
  0x49   : > { %s2178_s12 = scalar_lea.hbm %s2918_s3, 1408 }
  0x4a   : > { %p2179_p6 = scmp.ne.s32.totalorder %s2918_s3, %s2178_s12  ;;  %p2185_p5 = scmp.lt.u32.totalorder %s2178_s12, %s2918_s3 }
  0x4c   : > { %p2181_p10 = pnand %p2179_p6, %p2527_p13 }
  0x4e   : > { %p2182_p3 = pneg %p2181_p10 }
  0x50   : > { %p2187_p7 = pnand %p2185_p5, %p2182_p3 }
  0x52   : > { %2190 = shalt.err (!%p2187_p7)
}
  0x53   : > { %s2191_s19 = scalar_lea.vmem %s284_s24, 1408  ;;  %p2199_p1 = scmp.lt.s32.totalorder %s284_s24, %s284_s24 }
  0x54   : > { %p2192_p9 = scmp.ne.s32.totalorder %s284_s24, %s2191_s19  ;;  %p2200_p4 = scmp.lt.s32.totalorder %s2191_s19, %s2191_s19 }
  0x56   : > { %p2194_p12 = pnand %p2192_p9, %p2527_p13  ;;  %p2201_p8 = por %p2200_p4, %p2199_p1 }
  0x58   : > { %p2195_p0 = pneg %p2194_p12 }
  0x5a   : > { %p2202_p2 = pnand %p2201_p8, %p2195_p0 }
  0x5c   : > { %2205 = shalt.err (!%p2202_p2)
}
  0x5d   : > { %s2393_s22 = smov 128   ;;  %s2394_s26 = smov 8  }
  0x5e   : > { %2003 = dma.hbm_to_vmem [thread:$0]  (!%p2511_p11), %s2918_s3, 1408, %s284_s24, [#allocation7], %s2393_s22, %s2393_s22, %s2394_s26  }
  0x5f   : > { %s2395_s7 = smov [#allocation11]   ;;  %s2206_s18 = scalar_lea.hbm %s2921_s6, 1408 }
  0x60   : > { %s312_s8 = sshll.u32 %s2395_s7, 4  ;;  %p2207_p2 = scmp.ne.s32.totalorder %s2921_s6, %s2206_s18  ;;  %s313_s8 = int_to_ptr.vmem [resolvable:$true] %s312_s8 }
  0x61   : > { %p2213_p10 = scmp.lt.u32.totalorder %s2206_s18, %s2921_s6 }
  0x62   : > { %p2209_p8 = pnand %p2207_p2, %p2527_p13 }
  0x64   : > { %p2210_p6 = pneg %p2209_p8 }
  0x66   : > { %p2215_p3 = pnand %p2213_p10, %p2210_p6 }
  0x68   : > { %2218 = shalt.err (!%p2215_p3)
}
  0x69   : > { %s2219_s24 = scalar_lea.vmem %s313_s8, 1408  ;;  %p2227_p12 = scmp.lt.s32.totalorder %s313_s8, %s313_s8 }
  0x6a   : > { %p2220_p5 = scmp.ne.s32.totalorder %s313_s8, %s2219_s24  ;;  %p2228_p0 = scmp.lt.s32.totalorder %s2219_s24, %s2219_s24 }
  0x6c   : > { %p2222_p7 = pnand %p2220_p5, %p2527_p13  ;;  %p2229_p1 = por %p2228_p0, %p2227_p12 }
  0x6e   : > { %p2223_p9 = pneg %p2222_p7 }
  0x70   : > { %p2230_p4 = pnand %p2229_p1, %p2223_p9 }
  0x72   : > { %2233 = shalt.err (!%p2230_p4)
}
  0x73   : > { %2009 = dma.hbm_to_vmem [thread:$0]  (!%p2511_p11), %s2921_s6, 1408, %s313_s8, [#allocation10], %s2393_s22, %s2393_s22, %s2394_s26  }
  0x74   : > { %s42_s16 = sadd.s32 1, %s2382_s9  ;;  %s51_s20 = sadd.s32 1, %s2374_s29 }
  0x75   : > { %p44_p13 = scmp.ge.s32.totalorder %s42_s16, 2  ;;  %p58_p2 = scmp.ne.s32.totalorder %s2374_s29, %s2370_s28 }
  0x76   : > { %p59_p8 = scmp.eq.s32.totalorder %s2386_s10, 0  ;;  %p2025_p6 = scmp.lt.s32.totalorder %s2386_s10, 2 }
  0x77   : > { %s2963_s16 = smov (%p44_p13, %s42_s16), 0  ;;  %p2944_p3 = scmp.ne.s32.totalorder %s2937_s14, 0 }
  0x78   : > { %p60_p10 = por %p59_p8, %p58_p2  ;;  %s46_s27 = ssub.s32 %s2382_s9, %s2963_s16 }
  0x79   : > { %p2624_p5 = por %p2944_p3, %p58_p2  ;;  %s326_s12 = sand.u32 1, %s2374_s29  }
  0x7a   : > { %p49_p7 = scmp.eq.s32.totalorder %s46_s27, 0  ;;  %s1549_s8 = sshll.u32 %s326_s12, 8 }
  0x7b   : > { %s1638_s18 = sshll.u32 %s2382_s9, 12  ;;  %s330_s14 = scalar_lea.vmem [#allocation3], %s1549_s8 }
  0x7c   : > { %s2633_s21 = scalar_select %p49_p7, %s2374_s29, %s51_s20  }
  0x7d   : > { %s2638_s19 = scalar_lea.hbm %s2915_s0, %s1638_s18  ;;  %s339_s24 = sshll.u32 %s330_s14, 4  ;;  %s2646_s24 = int_to_ptr.vmem [resolvable:$true] %s339_s24 }
  0x7e   : > { %p2642_p11 = pnand %p2025_p6, %p60_p10  ;;  %s2648_s5 = scalar_lea.sflag [#allocation4], %s326_s12 }
  0x7f   : > { %s2234_s20 = scalar_lea.hbm %s2638_s19, 4096  ;;  %s2239_s18 = scalar_lea.hbm %s2915_s0, 8192 }
  0x80   : > { %p2235_p9 = scmp.ne.s32.totalorder %s2638_s19, %s2234_s20  ;;  %p2236_p12 = pneg %p2642_p11 }
  0x81   : > { %p2240_p4 = scmp.lt.u32.totalorder %s2638_s19, %s2915_s0  ;;  %p2241_p13 = scmp.lt.u32.totalorder %s2239_s18, %s2234_s20 }
  0x82   : > { %p2237_p0 = pnand %p2236_p12, %p2235_p9  ;;  %p2243_p8 = scmp.lt.u32.totalorder %s2234_s20, %s2638_s19 }
  0x83   : > { %p2242_p2 = por %p2241_p13, %p2240_p4 }
  0x84   : > { %p2238_p1 = pneg %p2237_p0 }
  0x85   : > { %p2244_p6 = por %p2243_p8, %p2242_p2 }
  0x87   : > { %p2245_p10 = pnand %p2244_p6, %p2238_p1 }
  0x89   : > { %2248 = shalt.err (!%p2245_p10)
}
  0x8a   : > { %s2249_s12 = scalar_lea.vmem %s2646_s24, 4096  ;;  %s2396_s14 = smov [#allocation3]  }
  0x8b   : > { %p2250_p3 = scmp.ne.s32.totalorder %s2646_s24, %s2249_s12  ;;  %s2254_s27 = sshll.u32 %s2396_s14, 4  ;;  %s2255_s27 = int_to_ptr.vmem [resolvable:$false] %s2254_s27 }
  0x8c   : > { %s2256_s8 = scalar_lea.vmem %s2255_s27, 8192  ;;  %p2257_p0 = scmp.lt.s32.totalorder %s2646_s24, %s2255_s27 }
  0x8d   : > { %p2252_p7 = pnand %p2250_p3, %p2236_p12  ;;  %p2258_p4 = scmp.lt.s32.totalorder %s2256_s8, %s2249_s12 }
  0x8f   : > { %p2253_p9 = pneg %p2252_p7  ;;  %p2259_p13 = por %p2258_p4, %p2257_p0 }
  0x91   : > { %p2260_p2 = pnand %p2259_p13, %p2253_p9 }
  0x93   : > { %2263 = shalt.err (!%p2260_p2)
}
  0x94   : > { %2013 = dma.hbm_to_vmem [thread:$0]  (!%p2642_p11), %s2638_s19, 4096, %s2646_s24, %s2648_s5, %s2393_s22, %s2393_s22, %s2394_s26  }
  0x95   : > { %p2947_p12 = scmp.ne.s32.totalorder %s2941_s17, 0 }
  0x96   : > { %s2682_s20 = sand.u32 (!%p2947_p12), 1, %s2370_s28   ;;  %p2948_p1 = scmp.ne.s32.totalorder (!%p2947_p12), %s2938_s15, 0 }
  0x97   : > { %351 = sbr.rel (%p2947_p12) target bundleno = 974 (0x3ce), region = 48  ;;  %s1553_s18 = sshll.u32 (!%p2947_p12), %s2682_s20, 8 }
  0x98   : > { %s354_s23 = scalar_lea.sflag (!%p2947_p12), [#allocation4], %s2682_s20  ;;  %s2686_s25 = scalar_lea.vmem (!%p2947_p12), [#allocation3], %s1553_s18 }
  0x9e   : > { %2345 = dma.done.wait (%p2948_p1), %s354_s23, 4096  }
  0x9f   : > { %2347 = vsyncadd (%p2948_p1), %s354_s23, 4294963200  ;;  %p2949_p11 = scmp.ne.s32.totalorder %s2936_s13, 0 }
  0xa1   : > { %2349 = dma.done.wait (%p2949_p11), [#allocation7], 2432  }
  0xa2   : > { %2351 = vsyncadd (%p2949_p11), [#allocation7], 4294964864 }
  0xa3   : > { %2353 = dma.done.wait (%p2949_p11), [#allocation10], 2432  }
  0xa4   : > { %2355 = vsyncadd (%p2949_p11), [#allocation10], 4294964864  ;;  %v2089_v0 = vld [vmem:[#allocation6] sm:$0xff]   ;;  %v2090_v1 = vld [vmem:[#allocation6 + $0x8] sm:$0xff]   ;;  %s1558_s17 = sshll.u32 %s2682_s20, 7  ;;  %s1682_s26 = sshll.u32 %s2378_s30, 11 }
  0xa5   : > { %1897 = vmatprep.subr.bf16.mxu0 %v2089_v0  ;;  %v2091_v2 = vld [vmem:[#allocation6 + $0x10] sm:$0xff]   ;;  %v2092_v3 = vld [vmem:[#allocation6 + $0x18] sm:$0xff]   ;;  %v429_v4 = vld [vmem:[%s2686_s25] sm:$0xff]  ;;  %s2744_s22 = scalar_lea.vmem [#allocation12], %s1558_s17  ;;  %s2950_s5 = sld [smem:[#allocation23_spill]] }
  0xa6   : > { %1898 = vmatpush3.bf16.msra.mxu0 %v2089_v0  ;;  %v430_v5 = vld [vmem:[%s2686_s25 + $0x8] sm:$0xff]  ;;  %v461_v6 = vmax.f32 %v429_v4, 0.0  ;;  %v2093_v9 = vld [vmem:[#allocation6 + $0x20] sm:$0xff]   ;;  %v2095_v11 = vld [vmem:[#allocation6 + $0x30] sm:$0xff]   ;;  %s1366_s19 = sshll.u32 %s2744_s22, 4  ;;  %s1346_s14 = scalar_lea.sflag [#allocation5], %s2682_s20  ;;  %s2815_s19 = int_to_ptr.vmem [resolvable:$true] %s1366_s19 }
  0xa7   : > { %1899 = vmatprep.subr.bf16.mxu0 %v2090_v1  ;;  %v462_v7 = vmax.f32 %v430_v5, 0.0  ;;  %v2094_v10 = vld [vmem:[#allocation6 + $0x28] sm:$0xff]   ;;  %v431_v12 = vld [vmem:[%s2686_s25 + $0x10] sm:$0xff]  ;;  %v432_v13 = vld [vmem:[%s2686_s25 + $0x18] sm:$0xff]  ;;  %s2264_s27 = scalar_lea.vmem %s2815_s19, 2048  ;;  %s2397_s8 = smov [#allocation12]  }
  0xa8   : > { %v463_v14 = vmax.f32 %v431_v12, 0.0  ;;  %v464_v15 = vmax.f32 %v432_v13, 0.0  ;;  %v2096_v16 = vld [vmem:[#allocation6 + $0x38] sm:$0xff]   ;;  %v433_v17 = vld [vmem:[%s2686_s25 + $0x20] sm:$0xff]  ;;  %v434_v18 = vld [vmem:[%s2686_s25 + $0x28] sm:$0xff]  ;;  %p2265_p8 = scmp.ne.s32.totalorder %s2815_s19, %s2264_s27  ;;  %s2268_s18 = sshll.u32 %s2397_s8, 4  ;;  %s2269_s18 = int_to_ptr.vmem [resolvable:$false] %s2268_s18 }
  0xa9   : > { %v493_v8 = vpack.c.bf16 %v462_v7, %v461_v6  ;;  %v465_v19 = vmax.f32 %v433_v17, 0.0  ;;  %v466_v20 = vmax.f32 %v434_v18, 0.0  ;;  %v435_v23 = vld [vmem:[%s2686_s25 + $0x30] sm:$0xff]  ;;  %v436_v24 = vld [vmem:[%s2686_s25 + $0x38] sm:$0xff]  ;;  %v437_v25 = vld [vmem:[%s2686_s25 + $0x40] sm:$0xff]  ;;  %s2270_s23 = scalar_lea.vmem %s2269_s18, 4096  ;;  %p2271_p3 = scmp.lt.s32.totalorder %s2815_s19, %s2269_s18 }
  0xaa   : > { %1900 = vmatpush3.bf16.msra.mxu0 %v2090_v1  ;;  %v494_v21 = vpack.c.bf16 %v464_v15, %v463_v14  ;;  %v438_v26 = vld [vmem:[%s2686_s25 + $0x48] sm:$0xff]  ;;  %v467_v27 = vmax.f32 %v435_v23, 0.0  ;;  %v468_v28 = vmax.f32 %v436_v24, 0.0  ;;  %v469_v29 = vmax.f32 %v437_v25, 0.0  ;;  %v439_v33 = vld [vmem:[%s2686_s25 + $0x50] sm:$0xff]  ;;  %v440_v34 = vld [vmem:[%s2686_s25 + $0x58] sm:$0xff]  ;;  %p2266_p6 = pnand %p2265_p8, %p2624_p5  ;;  %p2272_p7 = scmp.lt.s32.totalorder %s2270_s23, %s2264_s27 }
  0xab   : > { %1901 = vmatprep.subr.bf16.mxu0 %v2091_v2  ;;  %1913 = vmatprep.mubr.bf16.mxu0 %v493_v8  ;;  %v495_v22 = vpack.c.bf16 %v466_v20, %v465_v19  ;;  %v470_v30 = vmax.f32 %v438_v26, 0.0  ;;  %v441_v35 = vld [vmem:[%s2686_s25 + $0x60] sm:$0xff]  ;;  %v442_v36 = vld [vmem:[%s2686_s25 + $0x68] sm:$0xff]  ;;  %v471_v37 = vmax.f32 %v439_v33, 0.0  ;;  %v472_v38 = vmax.f32 %v440_v34, 0.0  ;;  %v443_v43 = vld [vmem:[%s2686_s25 + $0x70] sm:$0xff]  ;;  %s2813_s12 = scalar_lea.hbm %s2950_s5, %s1682_s26 }
  0xac   : > { %v496_v31 = vpack.c.bf16 %v468_v28, %v467_v27  ;;  %v473_v39 = vmax.f32 %v441_v35, 0.0  ;;  %v474_v40 = vmax.f32 %v442_v36, 0.0  ;;  %v444_v44 = vld [vmem:[%s2686_s25 + $0x78] sm:$0xff]  ;;  %v445_v45 = vld [vmem:[%s2686_s25 + $0x80] sm:$0xff]  ;;  %v446_v46 = vld [vmem:[%s2686_s25 + $0x88] sm:$0xff]  ;;  %v475_v47 = vmax.f32 %v443_v43, 0.0  ;;  %p2267_p10 = pneg %p2266_p6  ;;  %p2273_p9 = por %p2272_p7, %p2271_p3 }
  0xad   : > { %v497_v32 = vpack.c.bf16 %v470_v30, %v469_v29  ;;  %v498_v41 = vpack.c.bf16 %v472_v38, %v471_v37  ;;  %v476_v48 = vmax.f32 %v444_v44, 0.0  ;;  %v477_v49 = vmax.f32 %v445_v45, 0.0  ;;  %v447_v53 = vld [vmem:[%s2686_s25 + $0x90] sm:$0xff]  ;;  %v448_v54 = vld [vmem:[%s2686_s25 + $0x98] sm:$0xff]  ;;  %v449_v55 = vld [vmem:[%s2686_s25 + $0xa0] sm:$0xff] }
  0xae   : > { %1902 = vmatpush3.bf16.msra.mxu0 %v2091_v2  ;;  %v499_v42 = vpack.c.bf16 %v474_v40, %v473_v39  ;;  %v478_v50 = vmax.f32 %v446_v46, 0.0  ;;  %v450_v56 = vld [vmem:[%s2686_s25 + $0xa8] sm:$0xff]  ;;  %v479_v57 = vmax.f32 %v447_v53, 0.0  ;;  %v480_v58 = vmax.f32 %v448_v54, 0.0  ;;  %v451_v63 = vld [vmem:[%s2686_s25 + $0xb0] sm:$0xff]  ;;  %v452_v0 = vld [vmem:[%s2686_s25 + $0xb8] sm:$0xff]  ;;  %p2274_p0 = pnand %p2273_p9, %p2267_p10 }
  0xaf   : > { %1903 = vmatprep.subr.bf16.mxu0 %v2092_v3  ;;  %v500_v51 = vpack.c.bf16 %v476_v48, %v475_v47  ;;  %v481_v59 = vmax.f32 %v449_v55, 0.0  ;;  %v482_v60 = vmax.f32 %v450_v56, 0.0  ;;  %v453_v1 = vld [vmem:[%s2686_s25 + $0xc0] sm:$0xff]  ;;  %v454_v2 = vld [vmem:[%s2686_s25 + $0xc8] sm:$0xff]  ;;  %v484_v4 = vmax.f32 %v452_v0, 0.0  ;;  %v459_v19 = vld [vmem:[%s2686_s25 + $0xf0] sm:$0xff] }
  0xb0   : > { %v501_v52 = vpack.c.bf16 %v478_v50, %v477_v49  ;;  %v502_v61 = vpack.c.bf16 %v480_v58, %v479_v57  ;;  %v485_v5 = vmax.f32 %v453_v1, 0.0  ;;  %v486_v6 = vmax.f32 %v454_v2, 0.0  ;;  %v458_v12 = vld [vmem:[%s2686_s25 + $0xe8] sm:$0xff]  ;;  %v460_v20 = vld [vmem:[%s2686_s25 + $0xf8] sm:$0xff]  ;;  %v2735_v26 = vld [vmem:[%s2917_s2] ss:$0 sm:$0xff] }
  0xb1   : > { %v503_v62 = vpack.c.bf16 %v482_v60, %v481_v59  ;;  %v2099_v24 = vld [vmem:[#allocation8 + $0x4] ss:$8 sps:$4 sm:$0xff]  }
  0xb2   : > { %1904 = vmatpush3.bf16.msra.mxu0 %v2092_v3  ;;  %v483_v3 = vmax.f32 %v451_v63, 0.0  ;;  %v505_v8 = vpack.c.bf16 %v486_v6, %v485_v5  ;;  %1015 = vmatprep.mubr.bf16.mxu1 %v2099_v24 }
  0xb3   : > { %1905 = vmatprep.subr.bf16.mxu0 %v2093_v9 }
  0xb4   : > { %v504_v7 = vpack.c.bf16 %v484_v4, %v483_v3 }
  0xb6   : > { %1906 = vmatpush3.bf16.msra.mxu0 %v2093_v9  ;;  %v455_v9 = vld [vmem:[%s2686_s25 + $0xd0] sm:$0xff] }
  0xb7   : > { %1907 = vmatprep.subr.bf16.mxu0 %v2094_v10  ;;  %v487_v13 = vmax.f32 %v455_v9, 0.0 }
  0xba   : > { %1908 = vmatpush3.bf16.msra.mxu0 %v2094_v10  ;;  %v456_v10 = vld [vmem:[%s2686_s25 + $0xd8] sm:$0xff] }
  0xbb   : > { %1909 = vmatprep.subr.bf16.mxu0 %v2095_v11  ;;  %v488_v14 = vmax.f32 %v456_v10, 0.0 }
  0xbd   : > { %v506_v17 = vpack.c.bf16 %v488_v14, %v487_v13 }
  0xbe   : > { %1910 = vmatpush3.bf16.msra.mxu0 %v2095_v11  ;;  %v457_v11 = vld [vmem:[%s2686_s25 + $0xe0] sm:$0xff] }
  0xbf   : > { %1911 = vmatprep.subr.bf16.mxu0 %v2096_v16  ;;  %v489_v15 = vmax.f32 %v457_v11, 0.0 }
  0xc2   : > { %1912 = vmatpush3.bf16.msra.mxu0 %v2096_v16  ;;  %v490_v16 = vmax.f32 %v458_v12, 0.0 }
  0xc4   : > { %v507_v18 = vpack.c.bf16 %v490_v16, %v489_v15 }
  0xc5   : > { %1914 = vmatmul.mubr.bf16.vlgmr.msra.gmra.mrb[0].mxu0 %v494_v21  ;;  %v491_v21 = vmax.f32 %v459_v19, 0.0 }
  0xc6   : > { %1917 = vmatprep.mubr.bf16.mxu0 %v495_v22  ;;  %v492_v22 = vmax.f32 %v460_v20, 0.0 }
  0xc8   : > { %v508_v23 = vpack.c.bf16 %v492_v22, %v491_v21 }
  0xcd   : > { %1918 = vmatmul.mubr.bf16.gmra.mrb[4].mxu0 %v496_v31 }
  0xce   : > { %1921 = vmatprep.mubr.bf16.mxu0 %v497_v32 }
  0xd5   : > { %1922 = vmatmul.mubr.bf16.gmra.mrb[8].mxu0 %v498_v41 }
  0xd6   : > { %1925 = vmatprep.mubr.bf16.mxu0 %v499_v42 }
  0xdd   : > { %1926 = vmatmul.mubr.bf16.gmra.mrb[12].mxu0 %v500_v51 }
  0xde   : > { %1929 = vmatprep.mubr.bf16.mxu0 %v501_v52 }
  0xe5   : > { %1930 = vmatmul.mubr.bf16.gmra.mrb[16].mxu0 %v502_v61 }
  0xe6   : > { %1933 = vmatprep.mubr.bf16.mxu0 %v503_v62 }
  0xed   : > { %1934 = vmatmul.mubr.bf16.gmra.mrb[20].mxu0 %v504_v7 }
  0xee   : > { %1937 = vmatprep.mubr.bf16.mxu0 %v505_v8 }
  0xf5   : > { %1938 = vmatmul.mubr.bf16.gmra.mrb[24].mxu0 %v506_v17 }
  0xf6   : > { %1941 = vmatprep.mubr.bf16.mxu0 %v507_v18 }
  0xfd   : > { %1942 = vmatmul.mubr.bf16.gmra.mrb[28].mxu0 %v508_v23 }
 0x198   : > { %v1915_v25 = vpop.f32.mrb[0].mxu0 }
 0x199   : > { %v614_v27 = vpop.f32.mrb[1].mxu0  ;;  %v623_v29 = vadd.f32 %v1915_v25, %v2735_v26 }
 0x19a   : > { %v1916_v28 = vpop.f32.mrb[2].mxu0  ;;  %v615_v32 = vadd.f32 %v2735_v26, %v614_v27 }
 0x19b   : > { %v626_v30 = vadd.f32 %v1916_v28, %v2735_v26  ;;  %v617_v31 = vpop.f32.mrb[3].mxu0 }
 0x19c   : > { %v618_v33 = vadd.f32 %v2735_v26, %v617_v31 }
 0x19d   : > { %v2742_v34 = vpack.c.bf16 %v626_v30, %v623_v29 }
 0x19e   : > { %v741_v35 = vpack.c.bf16 %v618_v33, %v615_v32 }
 0x19f   : > { %1788 = vst [vmem:[%s2744_s22 + $0x8] sm:$0xff] %v2742_v34  }
 0x1a0   : > { %v1919_v36 = vpop.f32.mrb[4].mxu0  ;;  %1687 = vst [vmem:[%s2744_s22] sm:$0xff] %v741_v35  }
 0x1a1   : > { %v630_v37 = vpop.f32.mrb[5].mxu0  ;;  %v639_v39 = vadd.f32 %v1919_v36, %v2735_v26 }
 0x1a2   : > { %v1920_v38 = vpop.f32.mrb[6].mxu0  ;;  %v631_v42 = vadd.f32 %v2735_v26, %v630_v37 }
 0x1a3   : > { %v642_v40 = vadd.f32 %v1920_v38, %v2735_v26  ;;  %v633_v41 = vpop.f32.mrb[7].mxu0 }
 0x1a4   : > { %v634_v43 = vadd.f32 %v2735_v26, %v633_v41 }
 0x1a5   : > { %v2753_v44 = vpack.c.bf16 %v642_v40, %v639_v39 }
 0x1a6   : > { %v743_v45 = vpack.c.bf16 %v634_v43, %v631_v42  ;;  %v2114_v43 = vld [vmem:[#allocation9] sm:$0xff]  }
 0x1a7   : > { %1790 = vst [vmem:[%s2744_s22 + $0x18] sm:$0xff] %v2753_v44  }
 0x1a8   : > { %1789 = vst [vmem:[%s2744_s22 + $0x10] sm:$0xff] %v743_v45   ;;  %v1923_v46 = vpop.f32.mrb[8].mxu0 }
 0x1a9   : > { %v646_v47 = vpop.f32.mrb[9].mxu0  ;;  %v655_v49 = vadd.f32 %v1923_v46, %v2735_v26  ;;  %v2115_v46 = vld [vmem:[#allocation9 + $0x8] sm:$0xff]  }
 0x1aa   : > { %v1924_v48 = vpop.f32.mrb[10].mxu0  ;;  %v647_v52 = vadd.f32 %v2735_v26, %v646_v47  ;;  %v2102_v47 = vld [vmem:[#allocation8 + $0x10] ss:$8 sps:$4 sm:$0xff]  }
 0x1ab   : > { %v658_v50 = vadd.f32 %v1924_v48, %v2735_v26  ;;  %v649_v51 = vpop.f32.mrb[11].mxu0  ;;  %v2103_v48 = vld [vmem:[#allocation8 + $0x24] ss:$8 sps:$4 sm:$0xff]  }
 0x1ac   : > { %v650_v53 = vadd.f32 %v2735_v26, %v649_v51  ;;  %v2106_v51 = vld [vmem:[#allocation8 + $0x34] ss:$8 sps:$4 sm:$0xff]  }
 0x1ad   : > { %v2762_v54 = vpack.c.bf16 %v658_v50, %v655_v49  ;;  %v2117_v49 = vld [vmem:[#allocation9 + $0x18] sm:$0xff]   ;;  %v2105_v50 = vld [vmem:[#allocation8 + $0x20] ss:$8 sps:$4 sm:$0xff]  }
 0x1ae   : > { %v745_v55 = vpack.c.bf16 %v650_v53, %v647_v52  ;;  %v2108_v52 = vld [vmem:[#allocation8 + $0x30] ss:$8 sps:$4 sm:$0xff]   ;;  %v2109_v53 = vld [vmem:[#allocation8 + $0x44] ss:$8 sps:$4 sm:$0xff]  }
 0x1af   : > { %1792 = vst [vmem:[%s2744_s22 + $0x28] sm:$0xff] %v2762_v54  }
 0x1b0   : > { %1791 = vst [vmem:[%s2744_s22 + $0x20] sm:$0xff] %v745_v55   ;;  %v1927_v56 = vpop.f32.mrb[12].mxu0 }
 0x1b1   : > { %v662_v57 = vpop.f32.mrb[13].mxu0  ;;  %v671_v59 = vadd.f32 %v1927_v56, %v2735_v26 }
 0x1b2   : > { %v1928_v58 = vpop.f32.mrb[14].mxu0  ;;  %v663_v62 = vadd.f32 %v2735_v26, %v662_v57 }
 0x1b3   : > { %v674_v60 = vadd.f32 %v1928_v58, %v2735_v26  ;;  %v665_v61 = vpop.f32.mrb[15].mxu0  ;;  %v2118_v58 = vld [vmem:[#allocation9 + $0x20] sm:$0xff]  }
 0x1b4   : > { %v666_v63 = vadd.f32 %v2735_v26, %v665_v61  ;;  %v2121_v61 = vld [vmem:[#allocation9 + $0x38] sm:$0xff]  }
 0x1b5   : > { %v2771_v0 = vpack.c.bf16 %v674_v60, %v671_v59  ;;  %v2119_v59 = vld [vmem:[#allocation9 + $0x28] sm:$0xff]   ;;  %v2120_v60 = vld [vmem:[#allocation9 + $0x30] sm:$0xff]  }
 0x1b6   : > { %v2773_v1 = vpack.c.bf16 %v666_v63, %v663_v62 }
 0x1b7   : > { %1794 = vst [vmem:[%s2744_s22 + $0x38] sm:$0xff] %v2771_v0  }
 0x1b8   : > { %1793 = vst [vmem:[%s2744_s22 + $0x30] sm:$0xff] %v2773_v1   ;;  %v1931_v2 = vpop.f32.mrb[16].mxu0 }
 0x1b9   : > { %v678_v3 = vpop.f32.mrb[17].mxu0  ;;  %v687_v5 = vadd.f32 %v1931_v2, %v2735_v26 }
 0x1ba   : > { %v1932_v4 = vpop.f32.mrb[18].mxu0  ;;  %v679_v8 = vadd.f32 %v2735_v26, %v678_v3 }
 0x1bb   : > { %v690_v6 = vadd.f32 %v1932_v4, %v2735_v26  ;;  %v681_v7 = vpop.f32.mrb[19].mxu0 }
 0x1bc   : > { %v682_v9 = vadd.f32 %v2735_v26, %v681_v7 }
 0x1bd   : > { %v750_v10 = vpack.c.bf16 %v690_v6, %v687_v5 }
 0x1be   : > { %v749_v11 = vpack.c.bf16 %v682_v9, %v679_v8 }
 0x1bf   : > { %1796 = vst [vmem:[%s2744_s22 + $0x48] sm:$0xff] %v750_v10  }
 0x1c0   : > { %v1935_v12 = vpop.f32.mrb[20].mxu0  ;;  %1795 = vst [vmem:[%s2744_s22 + $0x40] sm:$0xff] %v749_v11   ;;  %1831 = vmatprep.subr.bf16.mxu1 %v749_v11 }
 0x1c1   : > { %v694_v13 = vpop.f32.mrb[21].mxu0  ;;  %1832 = vmatpush3.bf16.msra.mxu1 %v741_v35  ;;  %v703_v15 = vadd.f32 %v1935_v12, %v2735_v26 }
 0x1c2   : > { %v1936_v14 = vpop.f32.mrb[22].mxu0  ;;  %1833 = vmatprep.subr.bf16.mxu1 %v750_v10  ;;  %v695_v18 = vadd.f32 %v2735_v26, %v694_v13 }
 0x1c3   : > { %v706_v16 = vadd.f32 %v1936_v14, %v2735_v26  ;;  %v697_v17 = vpop.f32.mrb[23].mxu0 }
 0x1c4   : > { %v698_v19 = vadd.f32 %v2735_v26, %v697_v17 }
 0x1c5   : > { %v752_v20 = vpack.c.bf16 %v706_v16, %v703_v15  ;;  %1834 = vmatpush3.bf16.msra.mxu1 %v2742_v34 }
 0x1c6   : > { %v751_v21 = vpack.c.bf16 %v698_v19, %v695_v18 }
 0x1c7   : > { %1798 = vst [vmem:[%s2744_s22 + $0x58] sm:$0xff] %v752_v20  }
 0x1c8   : > { %1797 = vst [vmem:[%s2744_s22 + $0x50] sm:$0xff] %v751_v21   ;;  %v1939_v22 = vpop.f32.mrb[24].mxu0  ;;  %1835 = vmatprep.subr.bf16.mxu1 %v751_v21 }
 0x1c9   : > { %v710_v23 = vpop.f32.mrb[25].mxu0  ;;  %1836 = vmatpush3.bf16.msra.mxu1 %v743_v45  ;;  %v719_v25 = vadd.f32 %v1939_v22, %v2735_v26  ;;  %v2100_v45 = vld [vmem:[#allocation8 + $0x14] ss:$8 sps:$4 sm:$0xff]  }
 0x1ca   : > { %v1940_v24 = vpop.f32.mrb[26].mxu0  ;;  %1837 = vmatprep.subr.bf16.mxu1 %v752_v20  ;;  %v711_v29 = vadd.f32 %v2735_v26, %v710_v23 }
 0x1cb   : > { %v722_v27 = vadd.f32 %v1940_v24, %v2735_v26  ;;  %v713_v28 = vpop.f32.mrb[27].mxu0 }
 0x1cc   : > { %v714_v30 = vadd.f32 %v2735_v26, %v713_v28 }
 0x1cd   : > { %v754_v31 = vpack.c.bf16 %v722_v27, %v719_v25  ;;  %1838 = vmatpush3.bf16.msra.mxu1 %v2753_v44  ;;  %v2097_v44 = vld [vmem:[#allocation8] ss:$8 sps:$4 sm:$0xff]  }
 0x1ce   : > { %v753_v32 = vpack.c.bf16 %v714_v30, %v711_v29 }
 0x1cf   : > { %1800 = vst [vmem:[%s2744_s22 + $0x68] sm:$0xff] %v754_v31  }
 0x1d0   : > { %1799 = vst [vmem:[%s2744_s22 + $0x60] sm:$0xff] %v753_v32   ;;  %v1943_v33 = vpop.f32.mrb[28].mxu0  ;;  %1839 = vmatprep.subr.bf16.mxu1 %v753_v32 }
 0x1d1   : > { %v726_v34 = vpop.f32.mrb[29].mxu0  ;;  %1840 = vmatpush3.bf16.msra.mxu1 %v745_v55  ;;  %v735_v36 = vadd.f32 %v1943_v33, %v2735_v26  ;;  %v2111_v55 = vld [vmem:[#allocation8 + $0x40] ss:$8 sps:$4 sm:$0xff]  }
 0x1d2   : > { %v1944_v35 = vpop.f32.mrb[30].mxu0  ;;  %1841 = vmatprep.subr.bf16.mxu1 %v754_v31  ;;  %v727_v39 = vadd.f32 %v2735_v26, %v726_v34 }
 0x1d3   : > { %v738_v37 = vadd.f32 %v1944_v35, %v2735_v26  ;;  %v729_v38 = vpop.f32.mrb[31].mxu0 }
 0x1d4   : > { %v730_v40 = vadd.f32 %v2735_v26, %v729_v38  ;;  %v2116_v26 = vld [vmem:[#allocation9 + $0x10] sm:$0xff]  }
 0x1d5   : > { %v756_v41 = vpack.c.bf16 %v738_v37, %v735_v36  ;;  %1842 = vmatpush3.bf16.msra.mxu1 %v2762_v54  ;;  %v925_v54 = vld [vmem:[#allocation8 + $0x50] sm:$0xff] }
 0x1d6   : > { %v755_v42 = vpack.c.bf16 %v730_v40, %v727_v39  ;;  %v1611_v56 = vcombine.high %v925_v54, %v925_v54  ;;  %v1610_v57 = vcombine.low %v925_v54, %v925_v54 }
 0x1d7   : > { %1802 = vst [vmem:[%s2744_s22 + $0x78] sm:$0xff] %v756_v41  }
 0x1d8   : > { %1801 = vst [vmem:[%s2744_s22 + $0x70] sm:$0xff] %v755_v42   ;;  %1843 = vmatprep.subr.bf16.mxu1 %v755_v42 }
 0x1d9   : > { %1844 = vmatpush3.bf16.msra.mxu1 %v2773_v1 }
 0x1da   : > { %1845 = vmatprep.subr.bf16.mxu1 %v756_v41 }
 0x1dd   : > { %1846 = vmatpush3.bf16.msra.mxu1 %v2771_v0 }
 0x1de   : > { %1945 = vmatprep.subr.bf16.mxu1 %v2114_v43 }
 0x1e0   : > { %1016 = vmatmul.mubr.bf16.vlgmr.msra.gmra.mrb[0].mxu1 %v2097_v44 }
 0x1e1   : > { %1023 = vmatprep.mubr.bf16.mxu1 %v2100_v45  ;;  %1946 = vmatpush3.bf16.msra.mxu1 %v2114_v43 }
 0x1e2   : > { %1947 = vmatprep.subr.bf16.mxu1 %v2115_v46 }
 0x1e5   : > { %1948 = vmatpush3.bf16.msra.mxu1 %v2115_v46 }
 0x1e6   : > { %1949 = vmatprep.subr.bf16.mxu1 %v2116_v26 }
 0x1e8   : > { %1024 = vmatmul.mubr.bf16.gmra.mrb[4].mxu1 %v2102_v47 }
 0x1e9   : > { %1031 = vmatprep.mubr.bf16.mxu1 %v2103_v48  ;;  %1950 = vmatpush3.bf16.msra.mxu1 %v2116_v26 }
 0x1ea   : > { %1951 = vmatprep.subr.bf16.mxu1 %v2117_v49 }
 0x1ed   : > { %1952 = vmatpush3.bf16.msra.mxu1 %v2117_v49 }
 0x1ee   : > { %1953 = vmatprep.subr.bf16.mxu1 %v2118_v58 }
 0x1f0   : > { %1032 = vmatmul.mubr.bf16.gmra.mrb[8].mxu1 %v2105_v50 }
 0x1f1   : > { %1039 = vmatprep.mubr.bf16.mxu1 %v2106_v51  ;;  %1954 = vmatpush3.bf16.msra.mxu1 %v2118_v58 }
 0x1f2   : > { %1955 = vmatprep.subr.bf16.mxu1 %v2119_v59 }
 0x1f5   : > { %1956 = vmatpush3.bf16.msra.mxu1 %v2119_v59 }
 0x1f6   : > { %1957 = vmatprep.subr.bf16.mxu1 %v2120_v60 }
 0x1f8   : > { %1040 = vmatmul.mubr.bf16.gmra.mrb[12].mxu1 %v2108_v52 }
 0x1f9   : > { %1047 = vmatprep.mubr.bf16.mxu1 %v2109_v53  ;;  %1958 = vmatpush3.bf16.msra.mxu1 %v2120_v60 }
 0x1fa   : > { %1959 = vmatprep.subr.bf16.mxu1 %v2121_v61 }
 0x1fd   : > { %1960 = vmatpush3.bf16.msra.mxu1 %v2121_v61 }
 0x200   : > { %1048 = vmatmul.mubr.bf16.gmra.mrb[16].mxu1 %v2111_v55 }
 0x201   : > { %1055 = vmatprep.mubr.bf16.mxu1 %v1611_v56 }
 0x208   : > { %1056 = vmatmul.mubr.bf16.gmra.mrb[20].mxu1 %v1610_v57 }
 0x2b3   : > { %v1847_v62 = vpop.f32.mrb[0].mxu1 }
 0x2b4   : > { %v1848_v63 = vpop.f32.mrb[1].mxu1 }
 0x2b5   : > { %v1849_v0 = vadd.f32 %v1848_v63, %v1847_v62  ;;  %v1850_v1 = vpop.f32.mrb[2].mxu1 }
 0x2b6   : > { %v1851_v2 = vpop.f32.mrb[3].mxu1 }
 0x2b7   : > { %v1852_v3 = vadd.f32 %v1851_v2, %v1850_v1  ;;  %v1099_v4 = vmax.f32 %v1849_v0, 0.0 }
 0x2b9   : > { %v1100_v5 = vmax.f32 %v1852_v3, 0.0 }
 0x2bb   : > { %v1110_v6 = vpack.c.bf16 %v1100_v5, %v1099_v4  ;;  %v1853_v7 = vpop.f32.mrb[4].mxu1 }
 0x2bc   : > { %v1854_v8 = vpop.f32.mrb[5].mxu1 }
 0x2bd   : > { %v1855_v9 = vadd.f32 %v1854_v8, %v1853_v7  ;;  %v1856_v10 = vpop.f32.mrb[6].mxu1  ;;  %1961 = vmatprep.mubr.bf16.mxu1 %v1110_v6 }
 0x2be   : > { %v1857_v11 = vpop.f32.mrb[7].mxu1 }
 0x2bf   : > { %v1858_v12 = vadd.f32 %v1857_v11, %v1856_v10  ;;  %v1101_v13 = vmax.f32 %v1855_v9, 0.0 }
 0x2c1   : > { %v1102_v14 = vmax.f32 %v1858_v12, 0.0 }
 0x2c3   : > { %v1111_v15 = vpack.c.bf16 %v1102_v14, %v1101_v13  ;;  %v1859_v16 = vpop.f32.mrb[8].mxu1 }
 0x2c4   : > { %v1860_v17 = vpop.f32.mrb[9].mxu1 }
 0x2c5   : > { %v1861_v18 = vadd.f32 %v1860_v17, %v1859_v16  ;;  %v1862_v19 = vpop.f32.mrb[10].mxu1  ;;  %1962 = vmatmul.mubr.bf16.vlgmr.msra.gmra.mrb[24].mxu1 %v1111_v15 }
 0x2c6   : > { %v1863_v20 = vpop.f32.mrb[11].mxu1 }
 0x2c7   : > { %v1864_v21 = vadd.f32 %v1863_v20, %v1862_v19  ;;  %v1103_v22 = vmax.f32 %v1861_v18, 0.0 }
 0x2c9   : > { %v1104_v23 = vmax.f32 %v1864_v21, 0.0 }
 0x2cb   : > { %v1112_v24 = vpack.c.bf16 %v1104_v23, %v1103_v22  ;;  %v1865_v25 = vpop.f32.mrb[12].mxu1 }
 0x2cc   : > { %v1866_v27 = vpop.f32.mrb[13].mxu1 }
 0x2cd   : > { %v1867_v28 = vadd.f32 %v1866_v27, %v1865_v25  ;;  %v1868_v29 = vpop.f32.mrb[14].mxu1  ;;  %1965 = vmatprep.mubr.bf16.mxu1 %v1112_v24 }
 0x2ce   : > { %v1869_v30 = vpop.f32.mrb[15].mxu1 }
 0x2cf   : > { %v1870_v31 = vadd.f32 %v1869_v30, %v1868_v29  ;;  %v1105_v32 = vmax.f32 %v1867_v28, 0.0 }
 0x2d1   : > { %v1106_v33 = vmax.f32 %v1870_v31, 0.0 }
 0x2d3   : > { %v1113_v34 = vpack.c.bf16 %v1106_v33, %v1105_v32  ;;  %v1871_v35 = vpop.f32.mrb[16].mxu1 }
 0x2d4   : > { %v1872_v36 = vpop.f32.mrb[17].mxu1 }
 0x2d5   : > { %v1873_v37 = vadd.f32 %v1872_v36, %v1871_v35  ;;  %v1874_v38 = vpop.f32.mrb[18].mxu1  ;;  %1966 = vmatmul.mubr.bf16.gmra.mrb[28].mxu1 %v1113_v34 }
 0x2d6   : > { %v1875_v39 = vpop.f32.mrb[19].mxu1 }
 0x2d7   : > { %v1876_v40 = vadd.f32 %v1875_v39, %v1874_v38  ;;  %v1107_v41 = vmax.f32 %v1873_v37, 0.0 }
 0x2d9   : > { %v1108_v42 = vmax.f32 %v1876_v40, 0.0 }
 0x2db   : > { %v1114_v43 = vpack.c.bf16 %v1108_v42, %v1107_v41  ;;  %v1877_v44 = vpop.f32.mrb[20].mxu1 }
 0x2dc   : > { %v1878_v45 = vpop.f32.mrb[21].mxu1 }
 0x2dd   : > { %v1879_v46 = vadd.f32 %v1878_v45, %v1877_v44  ;;  %v1880_v26 = vpop.f32.mrb[22].mxu1  ;;  %1969 = vmatprep.mubr.bf16.mxu1 %v1114_v43 }
 0x2de   : > { %v1881_v47 = vpop.f32.mrb[23].mxu1 }
 0x2df   : > { %v1109_v48 = vmax.f32 %v1879_v46, 0.0 }
 0x2e1   : > { %v1115_v49 = vpack.c.bf16 %v1109_v48, %v1109_v48 }
 0x2e3   : > { %1970 = vmatmul.mubr.bf16.gmra.mrb[32].mxu1 %v1115_v49 }
 0x2e4   : > { %2277 = shalt.err (!%p2274_p0)
}
 0x2e5   : > { %s2278_s25 = scalar_lea.hbm %s2813_s12, 2048  ;;  %s2282_s17 = scalar_lea.hbm %s2950_s5, 4096 }
 0x2e6   : > { %p2279_p4 = scmp.ne.s32.totalorder %s2813_s12, %s2278_s25  ;;  %p2283_p12 = scmp.lt.u32.totalorder %s2813_s12, %s2950_s5 }
 0x2e7   : > { %p2284_p1 = scmp.lt.u32.totalorder %s2282_s17, %s2278_s25  ;;  %p2286_p8 = scmp.lt.u32.totalorder %s2278_s25, %s2813_s12 }
 0x2e8   : > { %p2280_p13 = pnand %p2279_p4, %p2624_p5 }
 0x2e9   : > { %p2285_p11 = por %p2284_p1, %p2283_p12 }
 0x2ea   : > { %p2281_p2 = pneg %p2280_p13 }
 0x2eb   : > { %p2287_p6 = por %p2286_p8, %p2285_p11 }
 0x2ed   : > { %p2288_p10 = pnand %p2287_p6, %p2281_p2 }
 0x2ef   : > { %2291 = shalt.err (!%p2288_p10)
}
 0x2f0   : > { %s2398_s24 = smov 64   ;;  %s2399_s11 = smov 4   ;;  %v1269_v54 = vld [vmem:[#allocation11 + $0x10] sm:$0xff]  ;;  %v1270_v57 = vld [vmem:[#allocation11 + $0x18] sm:$0xff]  ;;  %v1267_v58 = vld [vmem:[#allocation11] sm:$0xff] }
 0x2f1   : > { %1993 = dma.vmem_to_hbm [thread:$0]  (%p2624_p5), %s2815_s19, 2048, %s2813_s12, %s1346_s14, %s2398_s24, %s2398_s24, %s2399_s11   ;;  %v1268_v61 = vld [vmem:[#allocation11 + $0x8] sm:$0xff]  ;;  %v1273_v8 = vld [vmem:[#allocation11 + $0x30] sm:$0xff]  ;;  %v1274_v11 = vld [vmem:[#allocation11 + $0x38] sm:$0xff] }
 0x2f2   : > { %s2951_s18 = sld [smem:[#allocation22_spill]]  ;;  %s1973_s23 = smul.u32 44, %s2682_s20  ;;  %v1271_v12 = vld [vmem:[#allocation11 + $0x20] sm:$0xff]  ;;  %v1272_v15 = vld [vmem:[#allocation11 + $0x28] sm:$0xff]  ;;  %v1277_v24 = vld [vmem:[#allocation11 + $0x50] sm:$0xff] }
 0x2f3   : > { %v1275_v31 = vld [vmem:[#allocation11 + $0x40] sm:$0xff]  ;;  %v1276_v33 = vld [vmem:[#allocation11 + $0x48] sm:$0xff]  ;;  %s1974_s14 = smul.u32 704, %s2378_s30  ;;  %s2952_s15 = sld [smem:[#allocation24_spill]] }
 0x2f4   : > { %s2848_s19 = scalar_lea.vmem [#allocation13], %s1973_s23  ;;  %s1351_s22 = scalar_lea.sflag [#allocation14], %s2682_s20 }
 0x2f5   : > { %s1382_s12 = sshll.u32 %s2848_s19, 4  ;;  %s2400_s30 = smov [#allocation13]   ;;  %s2856_s12 = int_to_ptr.vmem [resolvable:$true] %s1382_s12 }
 0x2f6   : > { %s2292_s26 = scalar_lea.vmem %s2856_s12, 704  ;;  %s2296_s27 = sshll.u32 %s2400_s30, 4  ;;  %s2297_s27 = int_to_ptr.vmem [resolvable:$false] %s2296_s27 }
 0x2f7   : > { %p2293_p3 = scmp.ne.s32.totalorder %s2856_s12, %s2292_s26  ;;  %s2298_s8 = scalar_lea.vmem %s2297_s27, 1408 }
 0x2f8   : > { %v1612_v50 = vld [vmem:[%s2951_s18] ss:$0 sm:$0xff]  ;;  %p2299_p0 = scmp.lt.s32.totalorder %s2856_s12, %s2297_s27  ;;  %p2300_p4 = scmp.lt.s32.totalorder %s2298_s8, %s2292_s26 }
 0x2f9   : > { %s2862_s17 = scalar_lea.hbm %s2952_s15, %s1974_s14  ;;  %p2294_p7 = pnand %p2293_p3, %p2624_p5 }
 0x2fa   : > { %p2301_p13 = por %p2300_p4, %p2299_p0 }
 0x2fb   : > { %p2295_p9 = pneg %p2294_p7 }
 0x2fd   : > { %p2302_p2 = pnand %p2301_p13, %p2295_p9 }
 0x398   : > { %v1963_v51 = vpop.f32.mrb[24].mxu1 }
 0x399   : > { %v1230_v52 = vadd.f32 %v1963_v51, %v1612_v50  ;;  %v1221_v53 = vpop.f32.mrb[25].mxu1 }
 0x39a   : > { %v1222_v55 = vadd.f32 %v1612_v50, %v1221_v53  ;;  %v1964_v56 = vpop.f32.mrb[26].mxu1 }
 0x39b   : > { %v1233_v59 = vadd.f32 %v1964_v56, %v1612_v50  ;;  %v1224_v60 = vpop.f32.mrb[27].mxu1  ;;  %v1280_v63 = vmul.f32 %v1269_v54, %v1230_v52 }
 0x39c   : > { %v1225_v62 = vadd.f32 %v1612_v50, %v1224_v60  ;;  %v1278_v1 = vmul.f32 %v1267_v58, %v1222_v55 }
 0x39d   : > { %v1281_v0 = vmul.f32 %v1270_v57, %v1233_v59 }
 0x39e   : > { %v1279_v2 = vmul.f32 %v1268_v61, %v1225_v62 }
 0x39f   : > { %v1771_v3 = vpack.c.bf16 %v1281_v0, %v1280_v63 }
 0x3a0   : > { %v1766_v4 = vpack.c.bf16 %v1279_v2, %v1278_v1 }
 0x3a1   : > { %1803 = vst [vmem:[%s2848_s19 + $0x8] sm:$0xff] %v1771_v3  }
 0x3a2   : > { %1767 = vst [vmem:[%s2848_s19] sm:$0xff] %v1766_v4  }
 0x3a8   : > { %v1967_v5 = vpop.f32.mrb[28].mxu1 }
 0x3a9   : > { %v1246_v6 = vadd.f32 %v1967_v5, %v1612_v50  ;;  %v1237_v7 = vpop.f32.mrb[29].mxu1 }
 0x3aa   : > { %v1238_v9 = vadd.f32 %v1612_v50, %v1237_v7  ;;  %v1968_v10 = vpop.f32.mrb[30].mxu1 }
 0x3ab   : > { %v1249_v13 = vadd.f32 %v1968_v10, %v1612_v50  ;;  %v1240_v14 = vpop.f32.mrb[31].mxu1  ;;  %v1284_v17 = vmul.f32 %v1273_v8, %v1246_v6 }
 0x3ac   : > { %v1241_v16 = vadd.f32 %v1612_v50, %v1240_v14  ;;  %v1282_v19 = vmul.f32 %v1271_v12, %v1238_v9 }
 0x3ad   : > { %v1285_v18 = vmul.f32 %v1274_v11, %v1249_v13 }
 0x3ae   : > { %v1283_v20 = vmul.f32 %v1272_v15, %v1241_v16 }
 0x3af   : > { %v1781_v21 = vpack.c.bf16 %v1285_v18, %v1284_v17 }
 0x3b0   : > { %v1776_v22 = vpack.c.bf16 %v1283_v20, %v1282_v19 }
 0x3b1   : > { %1805 = vst [vmem:[%s2848_s19 + $0x18] sm:$0xff] %v1781_v21  }
 0x3b2   : > { %1804 = vst [vmem:[%s2848_s19 + $0x10] sm:$0xff] %v1776_v22  }
 0x3b6   : > { %v1971_v23 = vpop.f32.mrb[32].mxu1 }
 0x3b7   : > { %v1262_v25 = vadd.f32 %v1971_v23, %v1612_v50  ;;  %v1253_v27 = vpop.f32.mrb[33].mxu1 }
 0x3b8   : > { %v1254_v28 = vadd.f32 %v1612_v50, %v1253_v27  ;;  %v1972_v29 = vpop.f32.mrb[34].mxu1 }
 0x3b9   : > { %v1288_v30 = vmul.f32 %v1277_v24, %v1262_v25  ;;  %v1256_v32 = vpop.f32.mrb[35].mxu1 }
 0x3ba   : > { %v1257_v34 = vadd.f32 %v1612_v50, %v1256_v32  ;;  %v1286_v36 = vmul.f32 %v1275_v31, %v1254_v28 }
 0x3bb   : > { %v1681_v35 = vpack.c.bf16 %v1288_v30, %v1288_v30 }
 0x3bc   : > { %v1287_v37 = vmul.f32 %v1276_v33, %v1257_v34 }
 0x3bd   : > { %1344 = vst [vmem:[%s2848_s19 + $0x28] sm:$0xf] %v1681_v35 }
 0x3be   : > { %v1786_v38 = vpack.c.bf16 %v1287_v37, %v1286_v36 }
 0x3c0   : > { %1806 = vst [vmem:[%s2848_s19 + $0x20] sm:$0xff] %v1786_v38  }
 0x3c1   : > { %2305 = shalt.err (!%p2302_p2)
}
 0x3c2   : > { %s2306_s18 = scalar_lea.hbm %s2862_s17, 704  ;;  %s2310_s14 = scalar_lea.hbm %s2952_s15, 1408 }
 0x3c3   : > { %p2307_p12 = scmp.ne.s32.totalorder %s2862_s17, %s2306_s18  ;;  %p2311_p8 = scmp.lt.u32.totalorder %s2862_s17, %s2952_s15 }
 0x3c4   : > { %p2312_p6 = scmp.lt.u32.totalorder %s2310_s14, %s2306_s18  ;;  %p2314_p3 = scmp.lt.u32.totalorder %s2306_s18, %s2862_s17 }
 0x3c5   : > { %p2308_p1 = pnand %p2307_p12, %p2624_p5 }
 0x3c6   : > { %p2313_p10 = por %p2312_p6, %p2311_p8 }
 0x3c7   : > { %p2309_p11 = pneg %p2308_p1 }
 0x3c8   : > { %p2315_p7 = por %p2314_p3, %p2313_p10 }
 0x3ca   : > { %p2316_p9 = pnand %p2315_p7, %p2309_p11 }
 0x3cc   : > { %2319 = shalt.err (!%p2316_p9)
}
 0x3cd   : > { %1994 = dma.vmem_to_hbm [thread:$0]  (%p2624_p5), %s2856_s12, 704, %s2862_s17, %s1351_s22, %s2398_s24, %s2398_s24, %s2399_s11  }
 0x3ce PF: > { %s2953_s26 = sld [smem:[#allocation20_spill]]  ;;  %s2954_s30 = sld [smem:[#allocation21_spill]] }
 0x3cf   : > { %p2956_p4 = scmp.ge.s32.totalorder %s2386_s10, 2 }
 0x3d4   : > { %s1397_s27 = sand.u32 1, %s2953_s26   ;;  %p2955_p0 = scmp.ne.s32.totalorder %s2954_s30, 0 }
 0x3d5   : > { %s1398_s8 = scalar_lea.sflag [#allocation5], %s1397_s27 }
 0x3d6   : > { %p2015_p13 = pnand %p2956_p4, %p2955_p0 }
 0x3d8   : > { %2357 = dma.done.wait (!%p2015_p13), %s1398_s8, 2048  }
 0x3d9   : > { %2359 = vsyncadd (!%p2015_p13), %s1398_s8, 4294965248  ;;  %s1407_s7 = scalar_lea.sflag [#allocation14], %s1397_s27 }
 0x3da   : > { %2361 = dma.done.wait (!%p2015_p13), %s1407_s7, 704  }
 0x3db   : > { %2363 = vsyncadd (!%p2015_p13), %s1407_s7, 4294966592  ;;  %s30_s10 = sadd.s32 1, %s2386_s10   ;;  %s2957_s27 = smov %s2370_s28 }
 0x3dc   : > { %p27_p2 = scmp.ge.s32.totalorder %s30_s10, 4   ;;  %s2958_s28 = smov %s2374_s29 }
 0x3dd   : > { %s2959_s29 = smov %s2633_s21  ;;  %s2960_s30 = smov %s2382_s9 }
 0x3de   : > { %s2961_s9 = smov %s2963_s16  ;;  %29 = sbr.rel (!%p27_p2) target bundleno = 14 (0xe), region = 135 }
 0x3e5   :  { %1412 = vsyncpa [#allocation4], 1 }
 0x3e6   :  { %1414 = vsyncpa [#allocation4 + $0x1], 1 }
 0x3e7   :  { %1415 = vsyncpa [#allocation7], 1 }
 0x3e8   :  { %1416 = vsyncpa [#allocation10], 1 }
 0x3e9   :  { %1417 = vsyncpa [#allocation5], 1 }
 0x3ea   :  { %1419 = vsyncpa [#allocation5 + $0x1], 1 }
 0x3eb   :  { %1420 = vsyncpa [#allocation14], 1 }
 0x3ec   :  { %1422 = vsyncpa [#allocation14 + $0x1], 1 }

</bundles_post_ra>
